<compile_context>
chip_gen: v7x
topology: tpu7x:2x2x1
jax: 0.10.0
libtpu: 0.0.40
codegen_flags: <defaults>
</compile_context>

<pallas_src>
import math

import jax
import jax.numpy as jnp
from jax import lax
from jax.experimental import pallas as pl
from jax.experimental.pallas import tpu as pltpu


_NEG_BIG = -1e30  # bias for padded (fake) classes: never wins the argmax


def _pseudo_label_kernel(x_ref, u_ref, w_ref, b_ref,
                         logits_x_ref, logits_u_ref, pseudo_ref):
    """One batch tile: logits_{x,u} = act @ W + b ; pseudo = onehot(argmax_u)."""
    w = w_ref[...]                      # (F, NCP) bf16, VMEM-resident
    b = b_ref[...]                      # (1, NCP) f32 (padded lanes = -1e30)

    # Labeled branch: model(x_hat)
    logits_x = jnp.dot(x_ref[...].astype(jnp.bfloat16), w,
                       preferred_element_type=jnp.float32) + b
    logits_x_ref[...] = logits_x

    # Unlabeled branch: model(ub)
    logits_u = jnp.dot(u_ref[...].astype(jnp.bfloat16), w,
                       preferred_element_type=jnp.float32) + b
    logits_u_ref[...] = logits_u

    # pseudo_labels = eye(NC)[argmax(logits_u, axis=1)]
    tb, ncp = logits_u.shape
    col = lax.broadcasted_iota(jnp.int32, (tb, ncp), dimension=1)
    row_max = jnp.max(logits_u, axis=-1, keepdims=True)
    is_max = logits_u == row_max
    # torch.max returns the FIRST maximal index -> min index among the maxima.
    argmax_idx = jnp.min(jnp.where(is_max, col, ncp), axis=-1, keepdims=True)
    pseudo_ref[...] = (col == argmax_idx).astype(jnp.float32)


def _round_up(x, m):
    return (x + m - 1) // m * m


def pseudo_label_forward(x_hat, y_one_hot, ub, w, b, *, tile_b=128):
    """JAX wrapper reproducing PseudoLabel.forward with model = Linear(F, NC).

    Returns (model(x_hat), y_one_hot, model(ub), pseudo_labels).
    """
    B = x_hat.shape[0]
    F = math.prod(x_hat.shape[1:])
    NC = w.shape[1]
    NCP = _round_up(NC, 128)                      # lane-dense class axis

    x2 = x_hat.reshape(B, F)                      # free reshape (row-major)
    u2 = ub.reshape(B, F)

    TB = min(tile_b, _round_up(B, 8))             # sublane-aligned batch tile
    B_pad = _round_up(B, TB)
    if B_pad != B:
        pad = ((0, B_pad - B), (0, 0))
        x2 = jnp.pad(x2, pad)
        u2 = jnp.pad(u2, pad)

    # Pad classes to 128 lanes.  Padded weight columns are zero; padded bias
    # entries are hugely negative so a padded class can never be the argmax.
    w_p = jnp.pad(w.astype(jnp.bfloat16), ((0, 0), (0, NCP - NC)))
    b_p = jnp.concatenate(
        [b.reshape(1, NC).astype(jnp.float32),
         jnp.full((1, NCP - NC), _NEG_BIG, jnp.float32)], axis=1)

    out_shapes = (
        jax.ShapeDtypeStruct((B_pad, NCP), jnp.float32),   # model(x_hat)
        jax.ShapeDtypeStruct((B_pad, NCP), jnp.float32),   # model(ub)
        jax.ShapeDtypeStruct((B_pad, NCP), jnp.float32),   # pseudo one-hot
    )

    logits_x, logits_u, pseudo = pl.pallas_call(
        _pseudo_label_kernel,
        out_shape=out_shapes,
        grid=(B_pad // TB,),
        in_specs=[
            pl.BlockSpec((TB, F), lambda i: (i, 0)),       # x_hat tiles
            pl.BlockSpec((TB, F), lambda i: (i, 0)),       # ub tiles
            pl.BlockSpec((F, NCP), lambda i: (0, 0)),      # weights: resident
            pl.BlockSpec((1, NCP), lambda i: (0, 0)),      # bias:    resident
        ],
        out_specs=(
            pl.BlockSpec((TB, NCP), lambda i: (i, 0)),
            pl.BlockSpec((TB, NCP), lambda i: (i, 0)),
            pl.BlockSpec((TB, NCP), lambda i: (i, 0)),
        ),
        compiler_params=pltpu.CompilerParams(
            dimension_semantics=("parallel",)),
    )(x2, u2, w_p, b_p)

    return (logits_x[:B, :NC], y_one_hot, logits_u[:B, :NC], pseudo[:B, :NC])


if __name__ == "__main__":
    # Small shapes consistent with the module's semantics.
    B, C, H, W = 2, 4, 16, 16
    NC = 10                        # config.dataset_classes
    F = C * H * W

    key = jax.random.PRNGKey(0)
    k1, k2, k3, k4, k5 = jax.random.split(key, 5)

    x_hat = jax.random.normal(k1, (B, C, H, W), dtype=jnp.float32)
    ub = jax.random.normal(k2, (B, C, H, W), dtype=jnp.float32)
    labels = jax.random.randint(k3, (B,), 0, NC)
    y_one_hot = jax.nn.one_hot(labels, NC, dtype=jnp.float32)

    # Deterministic synthetic "model" parameters (linear classifier).
    w = jax.random.normal(k4, (F, NC), dtype=jnp.float32) * 0.02
    b = jax.random.normal(k5, (NC,), dtype=jnp.float32) * 0.01

    outs = jax.block_until_ready(
        pseudo_label_forward(x_hat, y_one_hot, ub, w, b))
    logits_x, y_oh, logits_u, pseudo = outs

    # Reference in plain JAX, using the same bf16 operand precision as the
    # kernel's MXU matmul (f32 accumulation).
    xh_bf = x_hat.reshape(B, F).astype(jnp.bfloat16)
    ub_bf = ub.reshape(B, F).astype(jnp.bfloat16)
    w_bf = w.astype(jnp.bfloat16)
    ref_x = jnp.dot(xh_bf, w_bf, preferred_element_type=jnp.float32) + b
    ref_u = jnp.dot(ub_bf, w_bf, preferred_element_type=jnp.float32) + b
    ref_pl = jax.nn.one_hot(jnp.argmax(ref_u, axis=1), NC, dtype=jnp.float32)

    assert logits_x.shape == (B, NC) and logits_u.shape == (B, NC)
    assert pseudo.shape == (B, NC)
    assert jnp.allclose(logits_x, ref_x, atol=1e-2, rtol=1e-2)
    assert jnp.allclose(logits_u, ref_u, atol=1e-2, rtol=1e-2)
    assert jnp.allclose(pseudo, ref_pl)
    assert jnp.allclose(y_oh, y_one_hot)

    print("KERNEL_OK")
</pallas_src>

<mosaic_0001>
module attributes {stable_mosaic.version = 11 : i64} {
  func.func @_pseudo_label_kernel(%arg0: i32, %arg1: memref<8x1024xf32, #tpu.memory_space<vmem>>, %arg2: memref<8x1024xf32, #tpu.memory_space<vmem>>, %arg3: memref<1024x128xbf16, #tpu.memory_space<vmem>>, %arg4: memref<1x128xf32, #tpu.memory_space<vmem>>, %arg5: memref<8x128xf32, #tpu.memory_space<vmem>>, %arg6: memref<8x128xf32, #tpu.memory_space<vmem>>, %arg7: memref<8x128xf32, #tpu.memory_space<vmem>>) attributes {dimension_semantics = [#tpu.dimension_semantics<parallel>], iteration_bounds = array<i64: 1>, scalar_prefetch = 0 : i64, scratch_operands = 0 : i64, tpu.core_type = #tpu.core_type<tc>, window_params = [{transform_indices = @transform_0, window_bounds = array<i64: 8, 1024>}, {transform_indices = @transform_1, window_bounds = array<i64: 8, 1024>}, {pipeline_mode = #tpu.pipeline_mode<synchronous>, transform_indices = @transform_2, window_bounds = array<i64: 1024, 128>}, {pipeline_mode = #tpu.pipeline_mode<synchronous>, transform_indices = @transform_3, window_bounds = array<i64: 1, 128>}, {transform_indices = @transform_4, window_bounds = array<i64: 8, 128>}, {transform_indices = @transform_5, window_bounds = array<i64: 8, 128>}, {transform_indices = @transform_6, window_bounds = array<i64: 8, 128>}]} {
    %c0 = arith.constant 0 : index
    %c0_0 = arith.constant 0 : index
    %0 = vector.load %arg3[%c0, %c0_0] : memref<1024x128xbf16, #tpu.memory_space<vmem>>, vector<1024x128xbf16>
    %c0_1 = arith.constant 0 : index
    %c0_2 = arith.constant 0 : index
    %1 = vector.load %arg4[%c0_1, %c0_2] : memref<1x128xf32, #tpu.memory_space<vmem>>, vector<1x128xf32>
    %c0_3 = arith.constant 0 : index
    %c0_4 = arith.constant 0 : index
    %2 = vector.load %arg1[%c0_3, %c0_4] : memref<8x1024xf32, #tpu.memory_space<vmem>>, vector<8x1024xf32>
    %3 = arith.truncf %2 : vector<8x1024xf32> to vector<8x1024xbf16>
    %cst = arith.constant dense<0.000000e+00> : vector<8x128xf32>
    %4 = tpu.matmul %3, %0, %cst {dimension_numbers = #tpu.dot_dimension_numbers<[1], [0], [0], [1], [0, 0, 1, 1], [], []>} : vector<8x1024xbf16>, vector<1024x128xbf16>, vector<8x128xf32> -> vector<8x128xf32>
    %5 = vector.broadcast %1 : vector<1x128xf32> to vector<8x128xf32>
    %6 = arith.addf %4, %5 : vector<8x128xf32>
    %c0_5 = arith.constant 0 : index
    %c0_6 = arith.constant 0 : index
    %7 = vector.load %arg5[%c0_5, %c0_6] : memref<8x128xf32, #tpu.memory_space<vmem>>, vector<8x128xf32>
    tpu.vector_store %arg5[%c0_5, %c0_6], %6 {strides = array<i32>} : memref<8x128xf32, #tpu.memory_space<vmem>>, vector<8x128xf32>,
    %c0_7 = arith.constant 0 : index
    %c0_8 = arith.constant 0 : index
    %8 = vector.load %arg2[%c0_7, %c0_8] : memref<8x1024xf32, #tpu.memory_space<vmem>>, vector<8x1024xf32>
    %9 = arith.truncf %8 : vector<8x1024xf32> to vector<8x1024xbf16>
    %cst_9 = arith.constant dense<0.000000e+00> : vector<8x128xf32>
    %10 = tpu.matmul %9, %0, %cst_9 {dimension_numbers = #tpu.dot_dimension_numbers<[1], [0], [0], [1], [0, 0, 1, 1], [], []>} : vector<8x1024xbf16>, vector<1024x128xbf16>, vector<8x128xf32> -> vector<8x128xf32>
    %11 = vector.broadcast %1 : vector<1x128xf32> to vector<8x128xf32>
    %12 = arith.addf %10, %11 : vector<8x128xf32>
    %c0_10 = arith.constant 0 : index
    %c0_11 = arith.constant 0 : index
    %13 = vector.load %arg6[%c0_10, %c0_11] : memref<8x128xf32, #tpu.memory_space<vmem>>, vector<8x128xf32>
    tpu.vector_store %arg6[%c0_10, %c0_11], %12 {strides = array<i32>} : memref<8x128xf32, #tpu.memory_space<vmem>>, vector<8x128xf32>,
    %14 = tpu.iota {dimensions = array<i32: 1>} : vector<8x128xi32>
    %cst_12 = arith.constant dense<0xFF800000> : vector<8xf32>
    %15 = vector.multi_reduction <maximumf>, %12, %cst_12 [1] : vector<8x128xf32> to vector<8xf32>
    %16 = vector.shape_cast %15 : vector<8xf32> to vector<8x1xf32>
    %17 = vector.broadcast %16 : vector<8x1xf32> to vector<8x128xf32>
    %18 = arith.cmpf oeq, %12, %17 : vector<8x128xf32>
    %c128_i32 = arith.constant 128 : i32
    %19 = vector.broadcast %c128_i32 : i32 to vector<8x128xi32>
    %20 = arith.select %18, %14, %19 : vector<8x128xi1>, vector<8x128xi32>
    %cst_13 = arith.constant dense<2147483647> : vector<8xi32>
    %21 = vector.multi_reduction <minsi>, %20, %cst_13 [1] : vector<8x128xi32> to vector<8xi32>
    %22 = vector.shape_cast %21 : vector<8xi32> to vector<8x1xi32>
    %23 = vector.broadcast %22 : vector<8x1xi32> to vector<8x128xi32>
    %24 = arith.cmpi eq, %14, %23 : vector<8x128xi32>
    %25 = arith.extui %24 : vector<8x128xi1> to vector<8x128xi32>
    %26 = arith.sitofp %25 : vector<8x128xi32> to vector<8x128xf32>
    %c0_14 = arith.constant 0 : index
    %c0_15 = arith.constant 0 : index
    %27 = vector.load %arg7[%c0_14, %c0_15] : memref<8x128xf32, #tpu.memory_space<vmem>>, vector<8x128xf32>
    tpu.vector_store %arg7[%c0_14, %c0_15], %26 {strides = array<i32>} : memref<8x128xf32, #tpu.memory_space<vmem>>, vector<8x128xf32>,
    return
  }
  func.func @transform_0(%arg0: i32) -> (i32, i32) {
    %c0_i32 = arith.constant 0 : i32
    %c0_i32_0 = arith.constant 0 : i32
    return %arg0, %c0_i32 : i32, i32
  }
  func.func @transform_1(%arg0: i32) -> (i32, i32) {
    %c0_i32 = arith.constant 0 : i32
    %c0_i32_0 = arith.constant 0 : i32
    return %arg0, %c0_i32 : i32, i32
  }
  func.func @transform_2(%arg0: i32) -> (i32, i32) {
    %c0_i32 = arith.constant 0 : i32
    %c0_i32_0 = arith.constant 0 : i32
    %c0_i32_1 = arith.constant 0 : i32
    return %c0_i32, %c0_i32_0 : i32, i32
  }
  func.func @transform_3(%arg0: i32) -> (i32, i32) {
    %c0_i32 = arith.constant 0 : i32
    %c0_i32_0 = arith.constant 0 : i32
    %c0_i32_1 = arith.constant 0 : i32
    return %c0_i32, %c0_i32_0 : i32, i32
  }
  func.func @transform_4(%arg0: i32) -> (i32, i32) {
    %c0_i32 = arith.constant 0 : i32
    %c0_i32_0 = arith.constant 0 : i32
    return %arg0, %c0_i32 : i32, i32
  }
  func.func @transform_5(%arg0: i32) -> (i32, i32) {
    %c0_i32 = arith.constant 0 : i32
    %c0_i32_0 = arith.constant 0 : i32
    return %arg0, %c0_i32 : i32, i32
  }
  func.func @transform_6(%arg0: i32) -> (i32, i32) {
    %c0_i32 = arith.constant 0 : i32
    %c0_i32_0 = arith.constant 0 : i32
    return %arg0, %c0_i32 : i32, i32
  }
}

</mosaic_0001>

<bundles_post_ra>
// kernel: tpu_custom_call.1
= control target key start
LH: loop header
LB: loop body
LE: loop exit
PB: predicated region body
PF: predicated region fallthrough
CT: control target
= control target key end

     0   :  { %12 = vsyncpa [#allocation3], 0  ;;  %s1830_s0 = inlined_call_operand.hbm [shape: f32[8,1024], index: 0, kind: input, shape index: {}]   ;;  %s1831_s1 = inlined_call_operand.hbm [shape: f32[8,1024], index: 1, kind: input, shape index: {}]   ;;  %s1832_s2 = inlined_call_operand.hbm [shape: bf16[1024,128], index: 2, kind: input, shape index: {}]   ;;  %s1833_s3 = inlined_call_operand.vmem [shape: f32[1,128], index: 3, kind: input, shape index: {}]   ;;  %s1834_s4 = inlined_call_operand.hbm [shape: f32[8,128], index: 4, kind: output, shape index: {0}]   ;;  %s1835_s5 = inlined_call_operand.hbm [shape: f32[8,128], index: 5, kind: output, shape index: {1}]   ;;  %s1836_s6 = inlined_call_operand.hbm [shape: f32[8,128], index: 6, kind: output, shape index: {2}]  }
   0x1   :  { %13 = vsyncpa [#allocation6], 0 }
   0x2   :  { %14 = vsyncpa [#allocation4], 0 }
   0x3   :  { %15 = vsyncpa [#allocation10], 0  ;;  %s1455_s21 = smov [#allocation5]   ;;  %s1456_s23 = smov [#allocation2]  }
   0x4   :  { %s32_s22 = sshll.u32 %s1455_s21, 4  ;;  %s22_s24 = sshll.u32 %s1456_s23, 4  ;;  %s33_s22 = int_to_ptr.vmem [resolvable:$true] %s32_s22  ;;  %s23_s24 = int_to_ptr.vmem [resolvable:$true] %s22_s24 }
   0x5   :  { %s1315_s27 = scalar_lea.hbm %s1831_s1, 1024 }
   0x6   :  { %p1316_p0 = scmp.ne.s32.totalorder %s1831_s1, %s1315_s27  ;;  %p1319_p1 = scmp.lt.u32.totalorder %s1315_s27, %s1831_s1 }
   0x8   :  { %p1321_p2 = pnand %p1319_p1, %p1316_p0 }
   0xa   :  { %1324 = shalt.err (!%p1321_p2)
}
   0xb   :  { %s1325_s8 = scalar_lea.vmem %s33_s22, 1024  ;;  %p1330_p4 = scmp.lt.s32.totalorder %s33_s22, %s33_s22 }
   0xc   :  { %p1326_p3 = scmp.ne.s32.totalorder %s33_s22, %s1325_s8  ;;  %p1331_p5 = scmp.lt.s32.totalorder %s1325_s8, %s1325_s8 }
   0xe   :  { %p1332_p6 = por %p1331_p5, %p1330_p4 }
  0x10   :  { %p1333_p7 = pnand %p1332_p6, %p1326_p3 }
  0x12   :  { %1336 = shalt.err (!%p1333_p7)
}
  0x13   :  { %35 = dma.hbm_to_vmem [thread:$0]  %s1831_s1, 1024, %s33_s22, [#allocation6]  }
  0x14   :  { %s1337_s13 = scalar_lea.hbm %s1830_s0, 1024 }
  0x15   :  { %p1338_p8 = scmp.ne.s32.totalorder %s1830_s0, %s1337_s13  ;;  %p1341_p9 = scmp.lt.u32.totalorder %s1337_s13, %s1830_s0 }
  0x17   :  { %p1343_p10 = pnand %p1341_p9, %p1338_p8 }
  0x19   :  { %1346 = shalt.err (!%p1343_p10)
}
  0x1a   :  { %s1347_s18 = scalar_lea.vmem %s23_s24, 1024  ;;  %p1352_p12 = scmp.lt.s32.totalorder %s23_s24, %s23_s24 }
  0x1b   :  { %p1348_p11 = scmp.ne.s32.totalorder %s23_s24, %s1347_s18  ;;  %p1353_p13 = scmp.lt.s32.totalorder %s1347_s18, %s1347_s18 }
  0x1d   :  { %p1354_p0 = por %p1353_p13, %p1352_p12 }
  0x1f   :  { %p1355_p1 = pnand %p1354_p0, %p1348_p11 }
  0x21   :  { %1358 = shalt.err (!%p1355_p1)
}
  0x22   :  { %25 = dma.hbm_to_vmem [thread:$0]  %s1830_s0, 1024, %s23_s24, [#allocation3]  }
  0x23   :  { %s1457_s20 = smov [#allocation7]   ;;  %s1359_s25 = scalar_lea.hbm %s1832_s2, 8192 }
  0x24   :  { %s41_s21 = sshll.u32 %s1457_s20, 4  ;;  %p1360_p2 = scmp.ne.s32.totalorder %s1832_s2, %s1359_s25  ;;  %s42_s21 = int_to_ptr.vmem [resolvable:$true] %s41_s21 }
  0x25   :  { %p1363_p3 = scmp.lt.u32.totalorder %s1359_s25, %s1832_s2 }
  0x27   :  { %p1365_p4 = pnand %p1363_p3, %p1360_p2 }
  0x29   :  { %1368 = shalt.err (!%p1365_p4)
}
  0x2a   :  { %s1369_s30 = scalar_lea.vmem %s42_s21, 8192  ;;  %p1374_p6 = scmp.lt.s32.totalorder %s42_s21, %s42_s21 }
  0x2b   :  { %p1370_p5 = scmp.ne.s32.totalorder %s42_s21, %s1369_s30  ;;  %p1375_p7 = scmp.lt.s32.totalorder %s1369_s30, %s1369_s30 }
  0x2d   :  { %p1376_p8 = por %p1375_p7, %p1374_p6 }
  0x2f   :  { %p1377_p9 = pnand %p1376_p8, %p1370_p5 }
  0x31   :  { %1380 = shalt.err (!%p1377_p9)
}
  0x32   :  { %s1458_s0 = smov 64   ;;  %s1459_s24 = smov 4  }
  0x33   :  { %47 = dma.hbm_to_vmem [thread:$0]  %s1832_s2, 8192, %s42_s21, [#allocation6], %s1458_s0, %s1458_s0, %s1459_s24  }
  0x34   :  { %1447 = dma.done.wait [#allocation3], 1024  }
  0x35   :  { %1448 = vsyncadd [#allocation3], 4294966272 }
  0x36   :  { %1449 = dma.done.wait [#allocation6], 9216  }
  0x37   :  { %1450 = vsyncadd [#allocation6], 4294958080  ;;  %v1535_v0 = vld [vmem:[#allocation7 + $0x40] sm:$0xff]   ;;  %v1546_v4 = vld [vmem:[#allocation7 + $0x48] sm:$0xff]   ;;  %s1461_s11 = smov [#allocation8]  }
  0x38   :  { %v1537_v1 = vld [vmem:[#allocation7 + $0xc0] sm:$0xff]   ;;  %1066 = vmatprep.subr.bf16.mxu0 %v1535_v0  ;;  %v1549_v5 = vld [vmem:[#allocation7 + $0xc8] sm:$0xff]   ;;  %v1558_v8 = vld [vmem:[#allocation7 + $0x50] sm:$0xff]   ;;  %s963_s12 = sshll.u32 %s1461_s11, 4  ;;  %s964_s12 = int_to_ptr.vmem [resolvable:$true] %s963_s12 }
  0x39   :  { %v1540_v2 = vld [vmem:[#allocation7] sm:$0xff]   ;;  %1088 = vmatprep.subr.bf16.mxu1 %v1537_v1  ;;  %v1552_v6 = vld [vmem:[#allocation7 + $0x8] sm:$0xff]   ;;  %v1561_v9 = vld [vmem:[#allocation7 + $0xd0] sm:$0xff]  }
  0x3a   :  { %v1543_v3 = vld [vmem:[#allocation7 + $0x80] sm:$0xff]   ;;  %1067 = vmatpush3.bf16.msra.mxu0 %v1540_v2  ;;  %v1555_v7 = vld [vmem:[#allocation7 + $0x88] sm:$0xff]   ;;  %v1564_v10 = vld [vmem:[#allocation7 + $0x10] sm:$0xff]  }
  0x3b   :  { %1089 = vmatpush3.bf16.msra.mxu1 %v1543_v3  ;;  %1068 = vmatprep.subr.bf16.mxu0 %v1546_v4  ;;  %v1567_v11 = vld [vmem:[#allocation7 + $0x90] sm:$0xff]   ;;  %v1570_v12 = vld [vmem:[#allocation7 + $0x58] sm:$0xff]   ;;  %v1582_v16 = vld [vmem:[#allocation7 + $0x60] sm:$0xff]  }
  0x3c   :  { %1090 = vmatprep.subr.bf16.mxu1 %v1549_v5  ;;  %v1573_v13 = vld [vmem:[#allocation7 + $0xd8] sm:$0xff]   ;;  %v1585_v17 = vld [vmem:[#allocation7 + $0xe0] sm:$0xff]   ;;  %v1594_v20 = vld [vmem:[#allocation7 + $0x68] sm:$0xff]  }
  0x3d   :  { %v1576_v14 = vld [vmem:[#allocation7 + $0x18] sm:$0xff]   ;;  %v1588_v18 = vld [vmem:[#allocation7 + $0x20] sm:$0xff]   ;;  %v1597_v21 = vld [vmem:[#allocation7 + $0xe8] sm:$0xff]  }
  0x3e   :  { %1069 = vmatpush3.bf16.msra.mxu0 %v1552_v6  ;;  %v1579_v15 = vld [vmem:[#allocation7 + $0x98] sm:$0xff]   ;;  %v1591_v19 = vld [vmem:[#allocation7 + $0xa0] sm:$0xff]   ;;  %v1600_v22 = vld [vmem:[#allocation7 + $0x28] sm:$0xff]  }
  0x3f   :  { %1091 = vmatpush3.bf16.msra.mxu1 %v1555_v7  ;;  %1070 = vmatprep.subr.bf16.mxu0 %v1558_v8  ;;  %v1603_v23 = vld [vmem:[#allocation7 + $0xa8] sm:$0xff]   ;;  %v1606_v24 = vld [vmem:[#allocation7 + $0x70] sm:$0xff]   ;;  %v1618_v28 = vld [vmem:[#allocation7 + $0x78] sm:$0xff]  }
  0x40   :  { %1092 = vmatprep.subr.bf16.mxu1 %v1561_v9  ;;  %v1609_v25 = vld [vmem:[#allocation7 + $0xf0] sm:$0xff]   ;;  %v1621_v29 = vld [vmem:[#allocation7 + $0xf8] sm:$0xff]   ;;  %v190_v32 = vld [vmem:[#allocation2 + $0x8] sm:$0xff] }
  0x41   :  { %v1612_v26 = vld [vmem:[#allocation7 + $0x30] sm:$0xff]   ;;  %v1624_v30 = vld [vmem:[#allocation7 + $0x38] sm:$0xff]   ;;  %v189_v34 = vld [vmem:[#allocation2] sm:$0xff]  ;;  %v198_v35 = vpack.c.bf16 %v190_v32, %v190_v32 }
  0x42   :  { %1071 = vmatpush3.bf16.msra.mxu0 %v1564_v10  ;;  %v1615_v27 = vld [vmem:[#allocation7 + $0xb0] sm:$0xff]   ;;  %v1627_v31 = vld [vmem:[#allocation7 + $0xb8] sm:$0xff]   ;;  %v197_v37 = vpack.c.bf16 %v189_v34, %v189_v34  ;;  %v1631_v40 = vld [vmem:[#allocation7 + $0x140] sm:$0xff]  }
  0x43   :  { %1093 = vmatpush3.bf16.msra.mxu1 %v1567_v11  ;;  %1072 = vmatprep.subr.bf16.mxu0 %v1570_v12  ;;  %v192_v33 = vld [vmem:[#allocation2 + $0x18] sm:$0xff]  ;;  %v191_v38 = vld [vmem:[#allocation2 + $0x10] sm:$0xff]  ;;  %v1633_v41 = vld [vmem:[#allocation7 + $0x1c0] sm:$0xff]  }
  0x44   :  { %1094 = vmatprep.subr.bf16.mxu1 %v1573_v13  ;;  %v200_v36 = vpack.c.bf16 %v192_v33, %v192_v33  ;;  %v199_v39 = vpack.c.bf16 %v191_v38, %v191_v38  ;;  %627 = vmatprep.mubr.bf16.mxu0 %v198_v35  ;;  %v1635_v42 = vld [vmem:[#allocation7 + $0x100] sm:$0xff]   ;;  %v1642_v44 = vld [vmem:[#allocation7 + $0x148] sm:$0xff]   ;;  %v1654_v48 = vld [vmem:[#allocation7 + $0x150] sm:$0xff]  }
  0x45   :  { %v1639_v43 = vld [vmem:[#allocation7 + $0x180] sm:$0xff]   ;;  %v1645_v45 = vld [vmem:[#allocation7 + $0x1c8] sm:$0xff]   ;;  %v1657_v49 = vld [vmem:[#allocation7 + $0x1d0] sm:$0xff]  }
  0x46   :  { %1073 = vmatpush3.bf16.msra.mxu0 %v1576_v14  ;;  %667 = vmatprep.mubr.bf16.mxu1 %v200_v36  ;;  %v1648_v46 = vld [vmem:[#allocation7 + $0x108] sm:$0xff]   ;;  %v1660_v50 = vld [vmem:[#allocation7 + $0x110] sm:$0xff]   ;;  %v1666_v52 = vld [vmem:[#allocation7 + $0x158] sm:$0xff]  }
  0x47   :  { %1095 = vmatpush3.bf16.msra.mxu1 %v1579_v15  ;;  %1074 = vmatprep.subr.bf16.mxu0 %v1582_v16  ;;  %v1651_v47 = vld [vmem:[#allocation7 + $0x188] sm:$0xff]   ;;  %v1663_v51 = vld [vmem:[#allocation7 + $0x190] sm:$0xff]   ;;  %v1669_v53 = vld [vmem:[#allocation7 + $0x1d8] sm:$0xff]  }
  0x48   :  { %1096 = vmatprep.subr.bf16.mxu1 %v1585_v17  ;;  %v1672_v54 = vld [vmem:[#allocation7 + $0x118] sm:$0xff]   ;;  %v1678_v56 = vld [vmem:[#allocation7 + $0x160] sm:$0xff]   ;;  %v1690_v60 = vld [vmem:[#allocation7 + $0x168] sm:$0xff]  }
  0x49   :  { %v1675_v55 = vld [vmem:[#allocation7 + $0x198] sm:$0xff]   ;;  %v1681_v57 = vld [vmem:[#allocation7 + $0x1e0] sm:$0xff]   ;;  %1851 = vst [vmem:[#allocation18_spill] sm:$0xff] %v1690_v60  ;;  %v1693_v61 = vld [vmem:[#allocation7 + $0x1e8] sm:$0xff]  }
  0x4a   :  { %1075 = vmatpush3.bf16.msra.mxu0 %v1588_v18  ;;  %v1684_v58 = vld [vmem:[#allocation7 + $0x120] sm:$0xff]   ;;  %1852 = vst [vmem:[#allocation19_spill] sm:$0xff] %v1693_v61  ;;  %v1696_v62 = vld [vmem:[#allocation7 + $0x128] sm:$0xff]   ;;  %v1702_v32 = vld [vmem:[#allocation7 + $0x170] sm:$0xff]  }
  0x4b   :  { %1097 = vmatpush3.bf16.msra.mxu1 %v1591_v19  ;;  %1076 = vmatprep.subr.bf16.mxu0 %v1594_v20  ;;  %1849 = vst [vmem:[#allocation16_spill] sm:$0xff] %v1684_v58  ;;  %v1687_v59 = vld [vmem:[#allocation7 + $0x1a0] sm:$0xff]   ;;  %1853 = vst [vmem:[#allocation20_spill] sm:$0xff] %v1696_v62  ;;  %v1699_v63 = vld [vmem:[#allocation7 + $0x1a8] sm:$0xff]  }
  0x4c   :  { %1098 = vmatprep.subr.bf16.mxu1 %v1597_v21  ;;  %1850 = vst [vmem:[#allocation17_spill] sm:$0xff] %v1687_v59  ;;  %1854 = vst [vmem:[#allocation21_spill] sm:$0xff] %v1699_v63  ;;  %v1705_v33 = vld [vmem:[#allocation7 + $0x1f0] sm:$0xff]   ;;  %v1714_v36 = vld [vmem:[#allocation7 + $0x178] sm:$0xff]  }
  0x4d   :  { %1855 = vst [vmem:[#allocation22_spill] sm:$0xff] %v1702_v32  ;;  %1856 = vst [vmem:[#allocation23_spill] sm:$0xff] %v1705_v33  ;;  %v1708_v34 = vld [vmem:[#allocation7 + $0x130] sm:$0xff]   ;;  %v1720_v38 = vld [vmem:[#allocation7 + $0x138] sm:$0xff]  }
  0x4e   :  { %1077 = vmatpush3.bf16.msra.mxu0 %v1600_v22  ;;  %1857 = vst [vmem:[#allocation24_spill] sm:$0xff] %v1708_v34  ;;  %v1711_v35 = vld [vmem:[#allocation7 + $0x1b0] sm:$0xff]   ;;  %1859 = vst [vmem:[#allocation26_spill] sm:$0xff] %v1714_v36 }
  0x4f   :  { %1099 = vmatpush3.bf16.msra.mxu1 %v1603_v23  ;;  %1078 = vmatprep.subr.bf16.mxu0 %v1606_v24  ;;  %1858 = vst [vmem:[#allocation25_spill] sm:$0xff] %v1711_v35 }
  0x50   :  { %1100 = vmatprep.subr.bf16.mxu1 %v1609_v25 }
  0x52   :  { %1079 = vmatpush3.bf16.msra.mxu0 %v1612_v26 }
  0x53   :  { %1101 = vmatpush3.bf16.msra.mxu1 %v1615_v27  ;;  %1080 = vmatprep.subr.bf16.mxu0 %v1618_v28 }
  0x54   :  { %1102 = vmatprep.subr.bf16.mxu1 %v1621_v29 }
  0x56   :  { %1081 = vmatpush3.bf16.msra.mxu0 %v1624_v30 }
  0x57   :  { %1103 = vmatpush3.bf16.msra.mxu1 %v1627_v31  ;;  %1110 = vmatprep.subr.bf16.mxu0 %v1631_v40 }
  0x58   :  { %1132 = vmatprep.subr.bf16.mxu1 %v1633_v41 }
  0x59   :  { %628 = vmatmul.mubr.bf16.vlgmr.msra.gmra.mrb[0].mxu0 %v197_v37  ;;  %v1717_v37 = vld [vmem:[#allocation7 + $0x1f8] sm:$0xff]  }
  0x5a   :  { %668 = vmatmul.mubr.bf16.vlgmr.msra.gmra.mrb[0].mxu1 %v199_v39  ;;  %1111 = vmatpush3.bf16.msra.mxu0 %v1635_v42  ;;  %1860 = vst [vmem:[#allocation27_spill] sm:$0xff] %v1717_v37  ;;  %v1723_v39 = vld [vmem:[#allocation7 + $0x1b8] sm:$0xff]  }
  0x5b   :  { %1133 = vmatpush3.bf16.msra.mxu1 %v1639_v43  ;;  %1112 = vmatprep.subr.bf16.mxu0 %v1642_v44 }
  0x5c   :  { %1134 = vmatprep.subr.bf16.mxu1 %v1645_v45 }
  0x5e   :  { %1113 = vmatpush3.bf16.msra.mxu0 %v1648_v46 }
  0x5f   :  { %1135 = vmatpush3.bf16.msra.mxu1 %v1651_v47  ;;  %1114 = vmatprep.subr.bf16.mxu0 %v1654_v48 }
  0x60   :  { %1136 = vmatprep.subr.bf16.mxu1 %v1657_v49 }
  0x62   :  { %1115 = vmatpush3.bf16.msra.mxu0 %v1660_v50 }
  0x63   :  { %1137 = vmatpush3.bf16.msra.mxu1 %v1663_v51  ;;  %1116 = vmatprep.subr.bf16.mxu0 %v1666_v52 }
  0x64   :  { %1138 = vmatprep.subr.bf16.mxu1 %v1669_v53 }
  0x66   :  { %1117 = vmatpush3.bf16.msra.mxu0 %v1672_v54 }
  0x67   :  { %1139 = vmatpush3.bf16.msra.mxu1 %v1675_v55  ;;  %1118 = vmatprep.subr.bf16.mxu0 %v1678_v56 }
  0x68   :  { %1140 = vmatprep.subr.bf16.mxu1 %v1681_v57 }
  0x6a   :  { %1119 = vmatpush3.bf16.msra.mxu0 %v1684_v58 }
  0x6b   :  { %1141 = vmatpush3.bf16.msra.mxu1 %v1687_v59  ;;  %1120 = vmatprep.subr.bf16.mxu0 %v1690_v60  ;;  %v757_v60 = vld [vmem:[#allocation5 + $0x8] sm:$0xff] }
  0x6c   :  { %1142 = vmatprep.subr.bf16.mxu1 %v1693_v61  ;;  %v195_v61 = vld [vmem:[#allocation2 + $0x30] sm:$0xff] }
  0x6d   :  { %v203_v59 = vpack.c.bf16 %v195_v61, %v195_v61 }
  0x6e   :  { %1121 = vmatpush3.bf16.msra.mxu0 %v1696_v62  ;;  %v193_v62 = vld [vmem:[#allocation2 + $0x20] sm:$0xff] }
  0x6f   :  { %1143 = vmatpush3.bf16.msra.mxu1 %v1699_v63  ;;  %1122 = vmatprep.subr.bf16.mxu0 %v1702_v32  ;;  %v194_v32 = vld [vmem:[#allocation2 + $0x28] sm:$0xff] }
  0x70   :  { %1144 = vmatprep.subr.bf16.mxu1 %v1705_v33  ;;  %v196_v33 = vld [vmem:[#allocation2 + $0x38] sm:$0xff]  ;;  %v202_v63 = vpack.c.bf16 %v194_v32, %v194_v32 }
  0x72   :  { %1123 = vmatpush3.bf16.msra.mxu0 %v1708_v34  ;;  %v204_v34 = vpack.c.bf16 %v196_v33, %v196_v33  ;;  %707 = vmatprep.mubr.bf16.mxu0 %v202_v63 }
  0x73   :  { %1145 = vmatpush3.bf16.msra.mxu1 %v1711_v35  ;;  %1124 = vmatprep.subr.bf16.mxu0 %v1714_v36  ;;  %v201_v35 = vpack.c.bf16 %v193_v62, %v193_v62  ;;  %v759_v36 = vld [vmem:[#allocation5 + $0x18] sm:$0xff] }
  0x74   :  { %1146 = vmatprep.subr.bf16.mxu1 %v1717_v37  ;;  %747 = vmatprep.mubr.bf16.mxu1 %v204_v34  ;;  %v765_v37 = vpack.c.bf16 %v757_v60, %v757_v60  ;;  %v767_v58 = vpack.c.bf16 %v759_v36, %v759_v36 }
  0x76   :  { %1125 = vmatpush3.bf16.msra.mxu0 %v1720_v38 }
  0x77   :  { %1147 = vmatpush3.bf16.msra.mxu1 %v1723_v39  ;;  %1154 = vmatprep.subr.bf16.mxu0 %v1535_v0  ;;  %v756_v0 = vld [vmem:[#allocation5] sm:$0xff] }
  0x78   :  { %1176 = vmatprep.subr.bf16.mxu1 %v1537_v1  ;;  %v758_v1 = vld [vmem:[#allocation5 + $0x10] sm:$0xff] }
  0x79   :  { %708 = vmatmul.mubr.bf16.vlgmr.msra.gmra.mrb[4].mxu0 %v201_v35 }
  0x7a   :  { %748 = vmatmul.mubr.bf16.vlgmr.msra.gmra.mrb[4].mxu1 %v203_v59  ;;  %1155 = vmatpush3.bf16.msra.mxu0 %v1540_v2  ;;  %v764_v2 = vpack.c.bf16 %v756_v0, %v756_v0 }
  0x7b   :  { %1177 = vmatpush3.bf16.msra.mxu1 %v1543_v3  ;;  %1156 = vmatprep.subr.bf16.mxu0 %v1546_v4  ;;  %v761_v3 = vld [vmem:[#allocation5 + $0x28] sm:$0xff]  ;;  %v766_v4 = vpack.c.bf16 %v758_v1, %v758_v1 }
  0x7c   :  { %1178 = vmatprep.subr.bf16.mxu1 %v1549_v5  ;;  %804 = vmatprep.mubr.bf16.mxu0 %v765_v37  ;;  %v763_v5 = vld [vmem:[#allocation5 + $0x38] sm:$0xff] }
  0x7d   :  { %844 = vmatprep.mubr.bf16.mxu1 %v767_v58 }
  0x7e   :  { %1157 = vmatpush3.bf16.msra.mxu0 %v1552_v6  ;;  %v769_v6 = vpack.c.bf16 %v761_v3, %v761_v3 }
  0x7f   :  { %1179 = vmatpush3.bf16.msra.mxu1 %v1555_v7  ;;  %1158 = vmatprep.subr.bf16.mxu0 %v1558_v8  ;;  %v771_v7 = vpack.c.bf16 %v763_v5, %v763_v5  ;;  %v1861_v8 = vld [vmem:[#allocation16_spill] sm:$0xff] }
  0x80   :  { %1180 = vmatprep.subr.bf16.mxu1 %v1561_v9  ;;  %v1862_v9 = vld [vmem:[#allocation17_spill] sm:$0xff] }
  0x82   :  { %1159 = vmatpush3.bf16.msra.mxu0 %v1564_v10  ;;  %v1863_v10 = vld [vmem:[#allocation18_spill] sm:$0xff] }
  0x83   :  { %1181 = vmatpush3.bf16.msra.mxu1 %v1567_v11  ;;  %1160 = vmatprep.subr.bf16.mxu0 %v1570_v12  ;;  %v1864_v11 = vld [vmem:[#allocation19_spill] sm:$0xff]  ;;  %v1865_v12 = vld [vmem:[#allocation20_spill] sm:$0xff] }
  0x84   :  { %1182 = vmatprep.subr.bf16.mxu1 %v1573_v13  ;;  %v1866_v13 = vld [vmem:[#allocation21_spill] sm:$0xff] }
  0x86   :  { %1161 = vmatpush3.bf16.msra.mxu0 %v1576_v14  ;;  %v1867_v14 = vld [vmem:[#allocation22_spill] sm:$0xff] }
  0x87   :  { %1183 = vmatpush3.bf16.msra.mxu1 %v1579_v15  ;;  %1162 = vmatprep.subr.bf16.mxu0 %v1582_v16  ;;  %v1868_v15 = vld [vmem:[#allocation23_spill] sm:$0xff]  ;;  %v1869_v16 = vld [vmem:[#allocation24_spill] sm:$0xff] }
  0x88   :  { %1184 = vmatprep.subr.bf16.mxu1 %v1585_v17  ;;  %v760_v17 = vld [vmem:[#allocation5 + $0x20] sm:$0xff] }
  0x8a   :  { %1163 = vmatpush3.bf16.msra.mxu0 %v1588_v18  ;;  %v1870_v18 = vld [vmem:[#allocation25_spill] sm:$0xff] }
  0x8b   :  { %1185 = vmatpush3.bf16.msra.mxu1 %v1591_v19  ;;  %1164 = vmatprep.subr.bf16.mxu0 %v1594_v20  ;;  %v1871_v19 = vld [vmem:[#allocation26_spill] sm:$0xff]  ;;  %v762_v20 = vld [vmem:[#allocation5 + $0x30] sm:$0xff] }
  0x8c   :  { %1186 = vmatprep.subr.bf16.mxu1 %v1597_v21  ;;  %v1872_v21 = vld [vmem:[#allocation27_spill] sm:$0xff] }
  0x8e   :  { %1165 = vmatpush3.bf16.msra.mxu0 %v1600_v22  ;;  %v768_v22 = vpack.c.bf16 %v760_v17, %v760_v17 }
  0x8f   :  { %1187 = vmatpush3.bf16.msra.mxu1 %v1603_v23  ;;  %1166 = vmatprep.subr.bf16.mxu0 %v1606_v24  ;;  %v770_v23 = vpack.c.bf16 %v762_v20, %v762_v20 }
  0x90   :  { %1188 = vmatprep.subr.bf16.mxu1 %v1609_v25 }
  0x92   :  { %1167 = vmatpush3.bf16.msra.mxu0 %v1612_v26  ;;  %v1000_v26 = vld [vmem:[%s1833_s3] ss:$0 sm:$0xff]  ;;  %s1460_s3 = smov [#allocation9]  }
  0x93   :  { %1189 = vmatpush3.bf16.msra.mxu1 %v1615_v27  ;;  %1168 = vmatprep.subr.bf16.mxu0 %v1618_v28  ;;  %s973_s10 = sshll.u32 %s1460_s3, 4  ;;  %s974_s10 = int_to_ptr.vmem [resolvable:$true] %s973_s10 }
  0x94   :  { %1190 = vmatprep.subr.bf16.mxu1 %v1621_v29  ;;  %s1381_s13 = scalar_lea.vmem %s974_s10, 128  ;;  %p1386_p11 = scmp.lt.s32.totalorder %s974_s10, %s974_s10 }
  0x95   :  { %p1382_p10 = scmp.ne.s32.totalorder %s974_s10, %s1381_s13  ;;  %p1387_p12 = scmp.lt.s32.totalorder %s1381_s13, %s1381_s13 }
  0x96   :  { %1169 = vmatpush3.bf16.msra.mxu0 %v1624_v30 }
  0x97   :  { %1191 = vmatpush3.bf16.msra.mxu1 %v1627_v31  ;;  %1198 = vmatprep.subr.bf16.mxu0 %v1631_v40  ;;  %p1388_p13 = por %p1387_p12, %p1386_p11 }
  0x98   :  { %1220 = vmatprep.subr.bf16.mxu1 %v1633_v41 }
  0x99   :  { %805 = vmatmul.mubr.bf16.vlgmr.msra.gmra.mrb[8].mxu0 %v764_v2  ;;  %p1389_p0 = pnand %p1388_p13, %p1382_p10 }
  0x9a   :  { %845 = vmatmul.mubr.bf16.vlgmr.msra.gmra.mrb[8].mxu1 %v766_v4  ;;  %1199 = vmatpush3.bf16.msra.mxu0 %v1635_v42 }
  0x9b   :  { %1221 = vmatpush3.bf16.msra.mxu1 %v1639_v43  ;;  %1200 = vmatprep.subr.bf16.mxu0 %v1642_v44 }
  0x9c   :  { %1222 = vmatprep.subr.bf16.mxu1 %v1645_v45  ;;  %884 = vmatprep.mubr.bf16.mxu0 %v769_v6 }
  0x9d   :  { %924 = vmatprep.mubr.bf16.mxu1 %v771_v7 }
  0x9e   :  { %1201 = vmatpush3.bf16.msra.mxu0 %v1648_v46 }
  0x9f   :  { %1223 = vmatpush3.bf16.msra.mxu1 %v1651_v47  ;;  %1202 = vmatprep.subr.bf16.mxu0 %v1654_v48 }
  0xa0   :  { %1224 = vmatprep.subr.bf16.mxu1 %v1657_v49 }
  0xa2   :  { %1203 = vmatpush3.bf16.msra.mxu0 %v1660_v50 }
  0xa3   :  { %1225 = vmatpush3.bf16.msra.mxu1 %v1663_v51  ;;  %1204 = vmatprep.subr.bf16.mxu0 %v1666_v52 }
  0xa4   :  { %1226 = vmatprep.subr.bf16.mxu1 %v1669_v53 }
  0xa6   :  { %1205 = vmatpush3.bf16.msra.mxu0 %v1672_v54 }
  0xa7   :  { %1227 = vmatpush3.bf16.msra.mxu1 %v1675_v55  ;;  %1206 = vmatprep.subr.bf16.mxu0 %v1678_v56 }
  0xa8   :  { %1228 = vmatprep.subr.bf16.mxu1 %v1681_v57 }
  0xaa   :  { %1207 = vmatpush3.bf16.msra.mxu0 %v1861_v8 }
  0xab   :  { %1229 = vmatpush3.bf16.msra.mxu1 %v1862_v9  ;;  %1208 = vmatprep.subr.bf16.mxu0 %v1863_v10  ;;  %v933_v9 = vlaneseq }
  0xac   :  { %1230 = vmatprep.subr.bf16.mxu1 %v1864_v11 }
  0xad   :  { %v934_v10 = vand.u32 127, %v933_v9 }
  0xae   :  { %1209 = vmatpush3.bf16.msra.mxu0 %v1865_v12 }
  0xaf   :  { %1231 = vmatpush3.bf16.msra.mxu1 %v1866_v13  ;;  %1210 = vmatprep.subr.bf16.mxu0 %v1867_v14 }
  0xb0   :  { %1232 = vmatprep.subr.bf16.mxu1 %v1868_v15 }
  0xb2   :  { %1211 = vmatpush3.bf16.msra.mxu0 %v1869_v16 }
  0xb3   :  { %1233 = vmatpush3.bf16.msra.mxu1 %v1870_v18  ;;  %1212 = vmatprep.subr.bf16.mxu0 %v1871_v19 }
  0xb4   :  { %1234 = vmatprep.subr.bf16.mxu1 %v1872_v21 }
  0xb6   :  { %1213 = vmatpush3.bf16.msra.mxu0 %v1720_v38 }
  0xb7   :  { %1235 = vmatpush3.bf16.msra.mxu1 %v1723_v39 }
  0xb9   :  { %885 = vmatmul.mubr.bf16.vlgmr.msra.gmra.mrb[12].mxu0 %v768_v22 }
  0xba   :  { %925 = vmatmul.mubr.bf16.vlgmr.msra.gmra.mrb[12].mxu1 %v770_v23 }
 0x12c   :  { %v1082_v24 = vpop.f32.mrb[0].mxu0 }
 0x12d   :  { %v1104_v25 = vpop.f32.mrb[0].mxu1  ;;  %v1083_v27 = vpop.f32.mrb[1].mxu0 }
 0x12e   :  { %v1105_v28 = vpop.f32.mrb[1].mxu1  ;;  %v1084_v29 = vadd.f32 %v1083_v27, %v1082_v24  ;;  %v1085_v31 = vpop.f32.mrb[2].mxu0 }
 0x12f   :  { %v1106_v30 = vadd.f32 %v1105_v28, %v1104_v25  ;;  %v1107_v40 = vpop.f32.mrb[2].mxu1  ;;  %v1086_v41 = vpop.f32.mrb[3].mxu0 }
 0x130   :  { %v1108_v42 = vpop.f32.mrb[3].mxu1  ;;  %v630_v43 = vadd.f32 %v1084_v29, %v1000_v26 }
 0x132   :  { %v670_v44 = vadd.f32 %v1106_v30, %v630_v43 }
 0x14c   :  { %v1126_v45 = vpop.f32.mrb[4].mxu0 }
 0x14d   :  { %v1148_v46 = vpop.f32.mrb[4].mxu1  ;;  %v1127_v47 = vpop.f32.mrb[5].mxu0 }
 0x14e   :  { %v1128_v48 = vadd.f32 %v1127_v47, %v1126_v45  ;;  %v1149_v49 = vpop.f32.mrb[5].mxu1  ;;  %v1129_v50 = vpop.f32.mrb[6].mxu0 }
 0x14f   :  { %v1150_v51 = vadd.f32 %v1149_v49, %v1148_v46  ;;  %v1151_v52 = vpop.f32.mrb[6].mxu1  ;;  %v1130_v53 = vpop.f32.mrb[7].mxu0 }
 0x150   :  { %v710_v54 = vadd.f32 %v1128_v48, %v670_v44  ;;  %v1152_v55 = vpop.f32.mrb[7].mxu1 }
 0x152   :  { %v750_v56 = vadd.f32 %v1150_v51, %v710_v54 }
 0x154   :  { %755 = vst [vmem:[#allocation8] sm:$0xff] %v750_v56 }
 0x16c   :  { %v1170_v57 = vpop.f32.mrb[8].mxu0 }
 0x16d   :  { %v1192_v58 = vpop.f32.mrb[8].mxu1  ;;  %v1171_v59 = vpop.f32.mrb[9].mxu0 }
 0x16e   :  { %v1172_v60 = vadd.f32 %v1171_v59, %v1170_v57  ;;  %v1193_v61 = vpop.f32.mrb[9].mxu1  ;;  %v1173_v62 = vpop.f32.mrb[10].mxu0 }
 0x16f   :  { %v1194_v63 = vadd.f32 %v1193_v61, %v1192_v58  ;;  %v1195_v32 = vpop.f32.mrb[10].mxu1  ;;  %v1174_v33 = vpop.f32.mrb[11].mxu0 }
 0x170   :  { %v807_v34 = vadd.f32 %v1172_v60, %v1000_v26  ;;  %v1196_v35 = vpop.f32.mrb[11].mxu1 }
 0x172   :  { %v847_v36 = vadd.f32 %v1194_v63, %v807_v34 }
 0x18c   :  { %v1214_v37 = vpop.f32.mrb[12].mxu0 }
 0x18d   :  { %v1236_v38 = vpop.f32.mrb[12].mxu1  ;;  %v1215_v39 = vpop.f32.mrb[13].mxu0 }
 0x18e   :  { %v1216_v0 = vadd.f32 %v1215_v39, %v1214_v37  ;;  %v1237_v1 = vpop.f32.mrb[13].mxu1  ;;  %v1217_v2 = vpop.f32.mrb[14].mxu0 }
 0x18f   :  { %v1238_v3 = vadd.f32 %v1237_v1, %v1236_v38  ;;  %v1239_v4 = vpop.f32.mrb[14].mxu1  ;;  %v1218_v5 = vpop.f32.mrb[15].mxu0 }
 0x190   :  { %v887_v6 = vadd.f32 %v1216_v0, %v847_v36  ;;  %v1240_v7 = vpop.f32.mrb[15].mxu1 }
 0x192   :  { %v927_v8 = vadd.f32 %v1238_v3, %v887_v6 }
 0x194   :  { %932 = vst [vmem:[#allocation9] sm:$0xff] %v927_v8  ;;  %935 = vmax.xlane.f32.xlu0 %v927_v8 }
 0x221   :  { %v936_v11 = vpop.xlane.xlu0 %935 }
 0x222   :  { %vm937_vm0 = vcmp.eq.f32.partialorder %v927_v8, %v936_v11 }
 0x223   :  { %v938_v12 = vsel %vm937_vm0, %v934_v10, 128 }
 0x224   :  { %v940_v13 = vshra.s32 %v938_v12, 16  ;;  %v939_v15 = vand.u32 65535, %v938_v12 }
 0x226   :  { %v942_v14 = vcvt.s32.f32 %v940_v13  ;;  %v941_v17 = vcvt.s32.f32 %v939_v15 }
 0x228   :  { %943 = vmin.xlane.f32.xlu0 %v942_v14 }
 0x2b5   :  { %v944_v16 = vpop.xlane.xlu0 %943 }
 0x2b6   :  { %vm945_vm1 = vcmp.eq.f32.partialorder %v942_v14, %v944_v16 }
 0x2b7   :  { %v946_v18 = vsel %vm945_vm1, %v941_v17, inf }
 0x2b8   :  { %947 = vmin.xlane.f32.xlu1 %v946_v18 }
 0x2b9   :  { %1392 = shalt.err (!%p1389_p0)
}
 0x2ba   :  { %s1393_s16 = scalar_lea.hbm %s1835_s5, 128 }
 0x2bb   :  { %p1394_p1 = scmp.ne.s32.totalorder %s1835_s5, %s1393_s16  ;;  %p1397_p2 = scmp.lt.u32.totalorder %s1393_s16, %s1835_s5 }
 0x2bd   :  { %p1399_p3 = pnand %p1397_p2, %p1394_p1 }
 0x2bf   :  { %1402 = shalt.err (!%p1399_p3)
}
 0x2c0   :  { %976 = dma.vmem_to_hbm [thread:$0]  %s974_s10, 128, %s1835_s5, [#allocation10]  }
 0x2c1   :  { %s1403_s22 = scalar_lea.vmem %s964_s12, 128  ;;  %p1408_p5 = scmp.lt.s32.totalorder %s964_s12, %s964_s12 }
 0x2c2   :  { %p1404_p4 = scmp.ne.s32.totalorder %s964_s12, %s1403_s22  ;;  %p1409_p6 = scmp.lt.s32.totalorder %s1403_s22, %s1403_s22 }
 0x2c4   :  { %p1410_p7 = por %p1409_p6, %p1408_p5 }
 0x2c6   :  { %p1411_p8 = pnand %p1410_p7, %p1404_p4 }
 0x2c8   :  { %1414 = shalt.err (!%p1411_p8)
}
 0x2c9   :  { %s1415_s26 = scalar_lea.hbm %s1834_s4, 128 }
 0x2ca   :  { %p1416_p9 = scmp.ne.s32.totalorder %s1834_s4, %s1415_s26  ;;  %p1419_p10 = scmp.lt.u32.totalorder %s1415_s26, %s1834_s4 }
 0x2cc   :  { %p1421_p11 = pnand %p1419_p10, %p1416_p9 }
 0x2ce   :  { %1424 = shalt.err (!%p1421_p11)
}
 0x2cf   :  { %966 = dma.vmem_to_hbm [thread:$0]  %s964_s12, 128, %s1834_s4, [#allocation4]   ;;  %v950_v19 = vcvt.f32.s32 %v944_v16  ;;  %v1463_v24 = vmov 0.0  }
 0x2d0   :  { %s1462_s24 = smov [#allocation11]  }
 0x2d1   :  { %v951_v21 = vshll.u32 %v950_v19, 16  ;;  %s983_s7 = sshll.u32 %s1462_s24, 4  ;;  %s984_s7 = int_to_ptr.vmem [resolvable:$true] %s983_s7 }
 0x2d2   :  { %s1425_s8 = scalar_lea.vmem %s984_s7, 128  ;;  %p1430_p13 = scmp.lt.s32.totalorder %s984_s7, %s984_s7 }
 0x2d3   :  { %p1426_p12 = scmp.ne.s32.totalorder %s984_s7, %s1425_s8  ;;  %p1431_p0 = scmp.lt.s32.totalorder %s1425_s8, %s1425_s8 }
 0x2d5   :  { %p1432_p1 = por %p1431_p0, %p1430_p13 }
 0x2d7   :  { %p1433_p2 = pnand %p1432_p1, %p1426_p12 }
 0x345   :  { %v948_v20 = vpop.xlane.xlu1 %947 }
 0x346   :  { %v949_v22 = vcvt.f32.s32 %v948_v20 }
 0x348   :  { %v952_v23 = vadd.s32 %v951_v21, %v949_v22 }
 0x34a   :  { %vm953_vm2 = vcmp.eq.s32.totalorder %v934_v10, %v952_v23 }
 0x34b   :  { %v1065_v25 = vsel %vm953_vm2, 1.0, %v1463_v24 }
 0x34c   :  { %956 = vst [vmem:[#allocation11] sm:$0xff] %v1065_v25 }
 0x34d   :  { %1436 = shalt.err (!%p1433_p2)
}
 0x34e   :  { %s1437_s9 = scalar_lea.hbm %s1836_s6, 128 }
 0x34f   :  { %p1438_p3 = scmp.ne.s32.totalorder %s1836_s6, %s1437_s9  ;;  %p1441_p4 = scmp.lt.u32.totalorder %s1437_s9, %s1836_s6 }
 0x351   :  { %p1443_p5 = pnand %p1441_p4, %p1438_p3 }
 0x353   :  { %1446 = shalt.err (!%p1443_p5)
}
 0x354   :  { %986 = dma.vmem_to_hbm [thread:$0]  %s984_s7, 128, %s1836_s6, [#allocation10]  }
 0x355   :  { %1451 = dma.done.wait [#allocation4], 128  }
 0x356   :  { %1452 = vsyncadd [#allocation4], 4294967168 }
 0x357   :  { %1453 = dma.done.wait [#allocation10], 256  }
 0x358   :  { %1454 = vsyncadd [#allocation10], 4294967040 }
 0x359   :  { %996 = vsyncpa [#allocation3], 1 }
 0x35a   :  { %997 = vsyncpa [#allocation6], 1 }
 0x35b   :  { %998 = vsyncpa [#allocation4], 1 }
 0x35c   :  { %999 = vsyncpa [#allocation10], 1 }

</bundles_post_ra>
